<compile_context>
chip_gen: v6e
topology: v6e:2x2x1
jax: 0.10.0
libtpu: 0.0.40
codegen_flags: <defaults>
</compile_context>

<pallas_src>
import math
import numpy as np
import jax
import jax.numpy as jnp
from jax import lax
from jax.experimental import pallas as pl
from jax.experimental.pallas import tpu as pltpu

# Conv params (module defaults for this instance)
K, S, P = 3, 1, 1
# MaxPool params
PK, PS, PP = 3, 2, 1
# Channels
C_IN, C_OUT = 4, 64

NEG = -1e30  # python float sentinel for MaxPool's -inf padding (never captured as a constant)


def tokenizer_forward(x_nchw, weight):
    """x_nchw: (B, C_IN, H, W) f32; weight: (C_OUT, C_IN, K, K) f32 -> (B, Hp*Wp, C_OUT)."""
    B0, Cin, H, W = x_nchw.shape
    Cout = weight.shape[0]
    if B0 % 2:  # pad batch to even so image pairs fill 128 lanes
        x_nchw = jnp.concatenate([x_nchw, jnp.zeros_like(x_nchw[:1])], axis=0)
    B = x_nchw.shape[0]
    G = B // 2

    Hc = (H + 2 * P - K) // S + 1
    Wc = (W + 2 * P - K) // S + 1
    Hp = (Hc + 2 * PP - PK) // PS + 1
    Wp = (Wc + 2 * PP - PK) // PS + 1
    # fused pool decomposition below assumes the default 3/2/1 pooling on even conv dims
    assert (PK, PS, PP) == (3, 2, 1) and Hc == 2 * Hp and Wc == 2 * Wp

    KKC = K * K * Cin
    KKC2 = 2 * KKC
    C2 = 2 * Cout
    NROWS = 2 * Hc * Wp  # == Hc * Wc conv positions, reordered by (w-parity, h, w//2)

    # ---------------- glue (pure XLA): layout + im2col + pair packing ----------------
    x = jnp.transpose(x_nchw, (0, 2, 3, 1))                       # NHWC
    xp = jnp.pad(x, ((0, 0), (P, P), (P, P), (0, 0)))             # conv zero padding
    cp = jnp.stack([xp[:, ki:ki + (Hc - 1) * S + 1:S, kj:kj + (Wc - 1) * S + 1:S, :]
                    for ki in range(K) for kj in range(K)], axis=3)
    cp = cp.reshape(B, Hc, Wc, KKC)                               # tap order (ki, kj, cin)
    # reorder conv positions to (w-parity, h, w//2): stride-2 pool needs no strided access
    cp = cp.reshape(B, Hc, Wp, 2, KKC).transpose(0, 3, 1, 2, 4).reshape(B, NROWS, KKC)
    # pack image pairs along the feature axis -> one (NROWS, 2*KKC) operand per pair
    cp = cp.reshape(G, 2, NROWS, KKC).transpose(0, 2, 1, 3).reshape(G, NROWS, KKC2)
    cp = cp.astype(jnp.bfloat16)

    # conv weight -> (KKC, Cout) matmul matrix matching the (ki,kj,cin) tap order,
    # made block-diagonal so the two packed images hit disjoint output lanes.
    w_mat = jnp.transpose(weight, (2, 3, 1, 0)).reshape(KKC, Cout)
    w2 = jnp.zeros((KKC2, C2), w_mat.dtype)
    w2 = w2.at[:KKC, :Cout].set(w_mat).at[KKC:, Cout:].set(w_mat)
    w2 = w2.astype(jnp.bfloat16)

    # ---------------- hot path: fused conv + max-pool Pallas kernel ----------------
    def kernel(cp_ref, w_ref, o_ref, ws, hs):
        # conv for every position of the image pair: one MXU matmul (f32 accumulate)
        conv = jnp.dot(cp_ref[...], w_ref[...], preferred_element_type=jnp.float32)
        c4 = conv.reshape(2, Hc, Wp, C2)          # (w-parity, h, w//2, packed channels)
        even = c4[0]                              # conv at w = 2*ow
        odd = c4[1]                               # conv at w = 2*ow + 1
        # W-direction max: window {2ow-1, 2ow, 2ow+1}; 2ow-1 = odd shifted by +1, NEG at ow=0
        ws[:, 0:1, :] = jnp.full((Hc, 1, C2), NEG, jnp.float32)
        ws[:, 1:Wp + 1, :] = odd
        wmax = jnp.maximum(jnp.maximum(even, odd), ws[:, 0:Wp, :])        # (Hc, Wp, C2)
        # H-direction max: window {2oh-1, 2oh, 2oh+1} via NEG-padded scratch + parity reshape
        neg_row = jnp.full((1, Wp, C2), NEG, jnp.float32)
        hs[0:1, :, :] = neg_row
        hs[Hc + 1:Hc + 2, :, :] = neg_row
        hs[1:Hc + 1, :, :] = wmax
        lo = hs[0:Hc, :, :].reshape(Hp, 2, Wp, C2)        # [:,0]->rows 2oh-1, [:,1]->rows 2oh
        hi = hs[2:Hc + 2, :, :].reshape(Hp, 2, Wp, C2)    # [:,0]->rows 2oh+1
        pooled = jnp.maximum(jnp.maximum(lo[:, 0], lo[:, 1]), hi[:, 0])   # (Hp, Wp, C2)
        o_ref[...] = pooled.astype(o_ref.dtype)           # lane-dense (..., 128) store

    cost = pl.CostEstimate(
        flops=2 * G * NROWS * KKC2 * C2,
        transcendentals=0,
        bytes_accessed=cp.size * 2 + w2.size * 2 + G * Hp * Wp * C2 * 4)

    out = pl.pallas_call(
        kernel,
        out_shape=jax.ShapeDtypeStruct((G, Hp, Wp, C2), jnp.float32),
        grid=(G,),
        in_specs=[
            pl.BlockSpec((None, NROWS, KKC2), lambda g: (g, 0, 0)),
            pl.BlockSpec((KKC2, C2), lambda g: (0, 0)),
        ],
        out_specs=pl.BlockSpec((None, Hp, Wp, C2), lambda g: (g, 0, 0, 0)),
        scratch_shapes=[
            pltpu.VMEM((Hc, Wp + 1, C2), jnp.float32),   # W-shift pad buffer
            pltpu.VMEM((Hc + 2, Wp, C2), jnp.float32),   # H-shift pad buffer
        ],
        compiler_params=pltpu.CompilerParams(dimension_semantics=("parallel",)),
        cost_estimate=cost,
    )(cp, w2)

    # unpack image pairs: lanes [0:Cout] -> image 2g, [Cout:2Cout] -> image 2g+1
    out = out.reshape(G, Hp * Wp, 2, Cout).transpose(0, 2, 1, 3).reshape(B, Hp * Wp, Cout)
    # TODO(synk): for large images (e.g. 224x224) add a halo-tiled grid axis over conv rows so
    # per-step blocks stay ~1-2 MiB (v7x 64 MiB VMEM) instead of one whole image pair per step.
    return out[:B0].astype(x_nchw.dtype)


if __name__ == "__main__":
    key = jax.random.PRNGKey(0)
    kx, kw = jax.random.split(key)

    B, H, W = 2, 16, 16
    x = jax.random.normal(kx, (B, C_IN, H, W), dtype=jnp.float32)           # NCHW input
    fan_in = C_IN * K * K
    weight = (jax.random.normal(kw, (C_OUT, C_IN, K, K), dtype=jnp.float32)
              * math.sqrt(2.0 / fan_in))                                    # kaiming_normal_

    out = jax.jit(tokenizer_forward)(x, weight)
    out = jax.block_until_ready(out)

    # Reference: plain XLA conv + max-pool + flatten/transpose
    ref_conv = lax.conv_general_dilated(
        x, weight, (S, S), ((P, P), (P, P)),
        dimension_numbers=("NCHW", "OIHW", "NCHW"),
        precision=lax.Precision.HIGHEST)
    ref_pool = lax.reduce_window(
        ref_conv, -jnp.inf, lax.max,
        (1, 1, PK, PK), (1, 1, PS, PS),
        [(0, 0), (0, 0), (PP, PP), (PP, PP)])
    ref = ref_pool.reshape(B, C_OUT, -1).transpose(0, 2, 1)                 # (B, seq, C_OUT)

    assert out.shape == ref.shape, (out.shape, ref.shape)
    np.testing.assert_allclose(np.asarray(out), np.asarray(ref), rtol=3e-2, atol=3e-2)
    print("KERNEL_OK")
</pallas_src>

<mosaic_0001>
module attributes {stable_mosaic.version = 11 : i64} {
  func.func @kernel(%arg0: i32, %arg1: memref<1x256x72xbf16, #tpu.memory_space<vmem>>, %arg2: memref<72x128xbf16, #tpu.memory_space<vmem>>, %arg3: memref<1x8x8x128xf32, #tpu.memory_space<vmem>>, %arg4: memref<16x9x128xf32, #tpu.memory_space<vmem>>, %arg5: memref<18x8x128xf32, #tpu.memory_space<vmem>>) attributes {dimension_semantics = [#tpu.dimension_semantics<parallel>], iteration_bounds = array<i64: 1>, scalar_prefetch = 0 : i64, scratch_operands = 2 : i64, tpu.core_type = #tpu.core_type<tc>, window_params = [{transform_indices = @transform_0, window_bounds = array<i64: 1, 256, 72>}, {pipeline_mode = #tpu.pipeline_mode<synchronous>, transform_indices = @transform_1, window_bounds = array<i64: 72, 128>}, {transform_indices = @transform_2, window_bounds = array<i64: 1, 8, 8, 128>}]} {
    %c0 = arith.constant 0 : index
    %c0_0 = arith.constant 0 : index
    %c0_1 = arith.constant 0 : index
    %0 = vector.load %arg1[%c0, %c0_0, %c0_1] : memref<1x256x72xbf16, #tpu.memory_space<vmem>>, vector<1x256x72xbf16>
    %1 = vector.shape_cast %0 : vector<1x256x72xbf16> to vector<256x72xbf16>
    %c0_2 = arith.constant 0 : index
    %c0_3 = arith.constant 0 : index
    %2 = vector.load %arg2[%c0_2, %c0_3] : memref<72x128xbf16, #tpu.memory_space<vmem>>, vector<72x128xbf16>
    %cst = arith.constant dense<0.000000e+00> : vector<256x128xf32>
    %3 = tpu.matmul %1, %2, %cst {dimension_numbers = #tpu.dot_dimension_numbers<[1], [0], [0], [1], [0, 0, 1, 1], [], []>} : vector<256x72xbf16>, vector<72x128xbf16>, vector<256x128xf32> -> vector<256x128xf32>
    %4 = vector.shape_cast %3 : vector<256x128xf32> to vector<2x16x8x128xf32>
    %5 = vector.extract_strided_slice %4 {offsets = [0, 0, 0, 0], sizes = [1, 16, 8, 128], strides = [1, 1, 1, 1]} : vector<2x16x8x128xf32> to vector<1x16x8x128xf32>
    %6 = vector.shape_cast %5 : vector<1x16x8x128xf32> to vector<16x8x128xf32>
    %7 = vector.extract_strided_slice %4 {offsets = [1, 0, 0, 0], sizes = [1, 16, 8, 128], strides = [1, 1, 1, 1]} : vector<2x16x8x128xf32> to vector<1x16x8x128xf32>
    %8 = vector.shape_cast %7 : vector<1x16x8x128xf32> to vector<16x8x128xf32>
    %cst_4 = arith.constant -1.000000e+30 : f32
    %9 = vector.broadcast %cst_4 : f32 to vector<16x1x128xf32>
    %c0_5 = arith.constant 0 : index
    %c0_6 = arith.constant 0 : index
    %c0_7 = arith.constant 0 : index
    %10 = vector.load %arg4[%c0_5, %c0_6, %c0_7] : memref<16x9x128xf32, #tpu.memory_space<vmem>>, vector<16x1x128xf32>
    tpu.vector_store %arg4[%c0_5, %c0_6, %c0_7], %9 {strides = array<i32>} : memref<16x9x128xf32, #tpu.memory_space<vmem>>, vector<16x1x128xf32>,
    %c0_8 = arith.constant 0 : index
    %c1 = arith.constant 1 : index
    %c0_9 = arith.constant 0 : index
    %11 = vector.load %arg4[%c0_8, %c1, %c0_9] : memref<16x9x128xf32, #tpu.memory_space<vmem>>, vector<16x8x128xf32>
    tpu.vector_store %arg4[%c0_8, %c1, %c0_9], %8 {strides = array<i32>} : memref<16x9x128xf32, #tpu.memory_space<vmem>>, vector<16x8x128xf32>,
    %12 = arith.maximumf %6, %8 : vector<16x8x128xf32>
    %c0_10 = arith.constant 0 : index
    %c0_11 = arith.constant 0 : index
    %c0_12 = arith.constant 0 : index
    %13 = vector.load %arg4[%c0_10, %c0_11, %c0_12] : memref<16x9x128xf32, #tpu.memory_space<vmem>>, vector<16x8x128xf32>
    %14 = arith.maximumf %12, %13 : vector<16x8x128xf32>
    %cst_13 = arith.constant -1.000000e+30 : f32
    %15 = vector.broadcast %cst_13 : f32 to vector<1x8x128xf32>
    %c0_14 = arith.constant 0 : index
    %c0_15 = arith.constant 0 : index
    %c0_16 = arith.constant 0 : index
    %16 = vector.load %arg5[%c0_14, %c0_15, %c0_16] : memref<18x8x128xf32, #tpu.memory_space<vmem>>, vector<1x8x128xf32>
    tpu.vector_store %arg5[%c0_14, %c0_15, %c0_16], %15 {strides = array<i32>} : memref<18x8x128xf32, #tpu.memory_space<vmem>>, vector<1x8x128xf32>,
    %c17 = arith.constant 17 : index
    %c0_17 = arith.constant 0 : index
    %c0_18 = arith.constant 0 : index
    %17 = vector.load %arg5[%c17, %c0_17, %c0_18] : memref<18x8x128xf32, #tpu.memory_space<vmem>>, vector<1x8x128xf32>
    tpu.vector_store %arg5[%c17, %c0_17, %c0_18], %15 {strides = array<i32>} : memref<18x8x128xf32, #tpu.memory_space<vmem>>, vector<1x8x128xf32>,
    %c1_19 = arith.constant 1 : index
    %c0_20 = arith.constant 0 : index
    %c0_21 = arith.constant 0 : index
    %18 = vector.load %arg5[%c1_19, %c0_20, %c0_21] : memref<18x8x128xf32, #tpu.memory_space<vmem>>, vector<16x8x128xf32>
    tpu.vector_store %arg5[%c1_19, %c0_20, %c0_21], %14 {strides = array<i32>} : memref<18x8x128xf32, #tpu.memory_space<vmem>>, vector<16x8x128xf32>,
    %c0_22 = arith.constant 0 : index
    %c0_23 = arith.constant 0 : index
    %c0_24 = arith.constant 0 : index
    %19 = vector.load %arg5[%c0_22, %c0_23, %c0_24] : memref<18x8x128xf32, #tpu.memory_space<vmem>>, vector<16x8x128xf32>
    %20 = vector.shape_cast %19 : vector<16x8x128xf32> to vector<8x2x8x128xf32>
    %c2 = arith.constant 2 : index
    %c0_25 = arith.constant 0 : index
    %c0_26 = arith.constant 0 : index
    %21 = vector.load %arg5[%c2, %c0_25, %c0_26] : memref<18x8x128xf32, #tpu.memory_space<vmem>>, vector<16x8x128xf32>
    %22 = vector.shape_cast %21 : vector<16x8x128xf32> to vector<8x2x8x128xf32>
    %23 = vector.extract_strided_slice %20 {offsets = [0, 0, 0, 0], sizes = [8, 1, 8, 128], strides = [1, 1, 1, 1]} : vector<8x2x8x128xf32> to vector<8x1x8x128xf32>
    %24 = vector.shape_cast %23 : vector<8x1x8x128xf32> to vector<8x8x128xf32>
    %25 = vector.extract_strided_slice %20 {offsets = [0, 1, 0, 0], sizes = [8, 1, 8, 128], strides = [1, 1, 1, 1]} : vector<8x2x8x128xf32> to vector<8x1x8x128xf32>
    %26 = vector.shape_cast %25 : vector<8x1x8x128xf32> to vector<8x8x128xf32>
    %27 = arith.maximumf %24, %26 : vector<8x8x128xf32>
    %28 = vector.extract_strided_slice %22 {offsets = [0, 0, 0, 0], sizes = [8, 1, 8, 128], strides = [1, 1, 1, 1]} : vector<8x2x8x128xf32> to vector<8x1x8x128xf32>
    %29 = vector.shape_cast %28 : vector<8x1x8x128xf32> to vector<8x8x128xf32>
    %30 = arith.maximumf %27, %29 : vector<8x8x128xf32>
    %c0_27 = arith.constant 0 : index
    %c0_28 = arith.constant 0 : index
    %c0_29 = arith.constant 0 : index
    %c0_30 = arith.constant 0 : index
    %31 = vector.load %arg3[%c0_27, %c0_28, %c0_29, %c0_30] : memref<1x8x8x128xf32, #tpu.memory_space<vmem>>, vector<1x8x8x128xf32>
    %32 = vector.shape_cast %31 : vector<1x8x8x128xf32> to vector<8x8x128xf32>
    %33 = vector.shape_cast %30 : vector<8x8x128xf32> to vector<1x8x8x128xf32>
    tpu.vector_store %arg3[%c0_27, %c0_28, %c0_29, %c0_30], %33 {strides = array<i32>} : memref<1x8x8x128xf32, #tpu.memory_space<vmem>>, vector<1x8x8x128xf32>,
    return
  }
  func.func @transform_0(%arg0: i32) -> (i32, i32, i32) {
    %c0_i32 = arith.constant 0 : i32
    %c0_i32_0 = arith.constant 0 : i32
    %c0_i32_1 = arith.constant 0 : i32
    return %arg0, %c0_i32, %c0_i32_0 : i32, i32, i32
  }
  func.func @transform_1(%arg0: i32) -> (i32, i32) {
    %c0_i32 = arith.constant 0 : i32
    %c0_i32_0 = arith.constant 0 : i32
    %c0_i32_1 = arith.constant 0 : i32
    return %c0_i32, %c0_i32_0 : i32, i32
  }
  func.func @transform_2(%arg0: i32) -> (i32, i32, i32, i32) {
    %c0_i32 = arith.constant 0 : i32
    %c0_i32_0 = arith.constant 0 : i32
    %c0_i32_1 = arith.constant 0 : i32
    %c0_i32_2 = arith.constant 0 : i32
    return %arg0, %c0_i32, %c0_i32_0, %c0_i32_1 : i32, i32, i32, i32
  }
}

</mosaic_0001>

<bundles_post_ra>
// kernel: tokenizer_forward.1
= control target key start
LH: loop header
LB: loop body
LE: loop exit
PB: predicated region body
PF: predicated region fallthrough
CT: control target
= control target key end

     0   :  { %vm209_vm0 = vcmask 1043456   ;;  %vm160_vm1 = vcmask 588800   ;;  %v661_v22 = vmov -1e+30   ;;  %s780_s1 = inlined_call_operand.vmem [shape: bf16[72,128], index: 1, kind: input, shape index: {}]   ;;  %s781_s0 = inlined_call_operand.vmem [shape: bf16[1,256,72], index: 0, kind: input, shape index: {}]   ;;  %s782_s2 = inlined_call_operand.vmem [shape: f32[1,8,8,128], index: 2, kind: output, shape index: {}]  }
   0x1   :  { %v640_v0 = vld [vmem:[%s780_s1 + $0x20] ss:$0 sps:$4 sm:$0xff]   ;;  %v641_v1 = vld [vmem:[%s780_s1 + $0x18] sm:$0xff]   ;;  %v642_v3 = vld [vmem:[%s780_s1 + $0x10] sm:$0xff]   ;;  %376 = vst [vmem:[#allocation2 + $0x20] sm:$0x1] %v661_v22 }
   0x2   :  { %637 = vmatprep.subr.msk.bf16.mxu0 %vm209_vm0, %v640_v0  ;;  %638 = vmatprep.subr.msk.bf16.mxu1 %vm209_vm0, %v640_v0  ;;  %v211_v2 = vsel %vm209_vm0, %v640_v0, 0  ;;  %v645_v4 = vld [vmem:[%s781_s0] sm:$0xff]   ;;  %v643_v6 = vld [vmem:[%s780_s1 + $0x8] sm:$0xff]   ;;  %v649_v10 = vld [vmem:[%s781_s0 + $0x10] sm:$0xff]   ;;  %374 = vst [vmem:[#allocation2] sm:$0x1] %v661_v22 }
   0x3   :  { %586 = vmatpush3.bf16.msra.mxu0 %v211_v2  ;;  %632 = vmatpush3.bf16.msra.mxu1 %v211_v2  ;;  %v646_v5 = vld [vmem:[%s781_s0 + $0x40] sm:$0xff]   ;;  %v647_v8 = vld [vmem:[%s781_s0 + $0x8] sm:$0xff]   ;;  %v650_v11 = vld [vmem:[%s781_s0 + $0x50] sm:$0xff]   ;;  %375 = vst [vmem:[#allocation2 + $0x10] sm:$0x1] %v661_v22 }
   0x4   :  { %587 = vmatprep.subr.bf16.mxu0 %v641_v1  ;;  %628 = vmatprep.subr.bf16.mxu1 %v641_v1  ;;  %v644_v7 = vld [vmem:[%s780_s1] sm:$0xff]   ;;  %v648_v9 = vld [vmem:[%s781_s0 + $0x48] sm:$0xff]   ;;  %v651_v12 = vld [vmem:[%s781_s0 + $0x18] sm:$0xff]   ;;  %377 = vst [vmem:[#allocation2 + $0x30] sm:$0x1] %v661_v22 }
   0x5   :  { %595 = vmatprep.mubr.msk.bf16.mxu0 %vm160_vm1, %v645_v4  ;;  %611 = vmatprep.mubr.msk.bf16.mxu1 %vm160_vm1, %v646_v5  ;;  %v652_v13 = vld [vmem:[%s781_s0 + $0x58] sm:$0xff]   ;;  %v653_v14 = vld [vmem:[%s781_s0 + $0x20] sm:$0xff]   ;;  %v655_v16 = vld [vmem:[%s781_s0 + $0x28] sm:$0xff]   ;;  %378 = vst [vmem:[#allocation2 + $0x40] sm:$0x1] %v661_v22 }
   0x6   :  { %v654_v15 = vld [vmem:[%s781_s0 + $0x60] sm:$0xff]   ;;  %v656_v17 = vld [vmem:[%s781_s0 + $0x68] sm:$0xff]   ;;  %v657_v18 = vld [vmem:[%s781_s0 + $0x30] sm:$0xff]   ;;  %379 = vst [vmem:[#allocation2 + $0x50] sm:$0x1] %v661_v22 }
   0x7   :  { %588 = vmatpush3.bf16.msra.mxu0 %v641_v1  ;;  %633 = vmatpush3.bf16.msra.mxu1 %v641_v1  ;;  %v658_v19 = vld [vmem:[%s781_s0 + $0x70] sm:$0xff]   ;;  %v659_v20 = vld [vmem:[%s781_s0 + $0x38] sm:$0xff]   ;;  %380 = vst [vmem:[#allocation2 + $0x60] sm:$0x1] %v661_v22  ;;  %381 = vst [vmem:[#allocation2 + $0x70] sm:$0x1] %v661_v22 }
   0x8   :  { %589 = vmatprep.subr.bf16.mxu0 %v642_v3  ;;  %629 = vmatprep.subr.bf16.mxu1 %v642_v3  ;;  %v660_v21 = vld [vmem:[%s781_s0 + $0x78] sm:$0xff]   ;;  %382 = vst [vmem:[#allocation2 + $0x80] sm:$0x1] %v661_v22  ;;  %383 = vst [vmem:[#allocation2 + $0x90] sm:$0x1] %v661_v22 }
   0x9   :  { %384 = vst [vmem:[#allocation2 + $0xa0] sm:$0x1] %v661_v22  ;;  %385 = vst [vmem:[#allocation2 + $0xb0] sm:$0x1] %v661_v22 }
   0xa   :  { %386 = vst [vmem:[#allocation2 + $0xc0] sm:$0x1] %v661_v22  ;;  %387 = vst [vmem:[#allocation2 + $0xd0] sm:$0x1] %v661_v22 }
   0xb   :  { %590 = vmatpush3.bf16.msra.mxu0 %v642_v3  ;;  %634 = vmatpush3.bf16.msra.mxu1 %v642_v3  ;;  %388 = vst [vmem:[#allocation2 + $0xe0] sm:$0x1] %v661_v22  ;;  %389 = vst [vmem:[#allocation2 + $0xf0] sm:$0x1] %v661_v22 }
   0xc   :  { %591 = vmatprep.subr.bf16.mxu0 %v643_v6  ;;  %630 = vmatprep.subr.bf16.mxu1 %v643_v6 }
   0xf   :  { %592 = vmatpush3.bf16.msra.mxu0 %v643_v6  ;;  %635 = vmatpush3.bf16.msra.mxu1 %v643_v6 }
  0x10   :  { %593 = vmatprep.subr.bf16.mxu0 %v644_v7  ;;  %631 = vmatprep.subr.bf16.mxu1 %v644_v7 }
  0x13   :  { %594 = vmatpush3.bf16.msra.mxu0 %v644_v7  ;;  %636 = vmatpush3.bf16.msra.mxu1 %v644_v7 }
  0x16   :  { %596 = vmatmul.mubr.msk.bf16.vlgmr.msra.gmra.mxu0 %vm160_vm1, %v647_v8  ;;  %612 = vmatmul.mubr.msk.bf16.vlgmr.msra.gmra.mxu1 %vm160_vm1, %v648_v9 }
  0x17   :  { %599 = vmatprep.mubr.msk.bf16.mxu0 %vm160_vm1, %v649_v10  ;;  %615 = vmatprep.mubr.msk.bf16.mxu1 %vm160_vm1, %v650_v11 }
  0x1e   :  { %600 = vmatmul.mubr.msk.bf16.gmra.mxu0 %vm160_vm1, %v651_v12  ;;  %616 = vmatmul.mubr.msk.bf16.gmra.mxu1 %vm160_vm1, %v652_v13 }
  0x1f   :  { %603 = vmatprep.mubr.msk.bf16.mxu0 %vm160_vm1, %v653_v14  ;;  %619 = vmatprep.mubr.msk.bf16.mxu1 %vm160_vm1, %v654_v15 }
  0x26   :  { %604 = vmatmul.mubr.msk.bf16.gmra.mxu0 %vm160_vm1, %v655_v16  ;;  %620 = vmatmul.mubr.msk.bf16.gmra.mxu1 %vm160_vm1, %v656_v17 }
  0x27   :  { %607 = vmatprep.mubr.msk.bf16.mxu0 %vm160_vm1, %v657_v18  ;;  %623 = vmatprep.mubr.msk.bf16.mxu1 %vm160_vm1, %v658_v19 }
  0x2e   :  { %608 = vmatmul.mubr.msk.bf16.gmra.mxu0 %vm160_vm1, %v659_v20  ;;  %624 = vmatmul.mubr.msk.bf16.gmra.mxu1 %vm160_vm1, %v660_v21 }
  0xd6   :  { %v597_v23 = vpop.f32.mrf.mxu0  ;;  %v613_v24 = vpop.f32.mrf.mxu1 }
  0xd7   :  { %392 = vst [vmem:[#allocation2 + $0x21] sm:$0xff] %v613_v24  ;;  %v408_v41 = vmax.f32 %v597_v23, %v613_v24 }
  0xd8   :  { %v247_v25 = vpop.f32.mrf.mxu0  ;;  %v311_v26 = vpop.f32.mrf.mxu1 }
  0xd9   :  { %390 = vst [vmem:[#allocation2 + $0x1] sm:$0xff] %v311_v26  ;;  %v406_v33 = vmax.f32 %v247_v25, %v311_v26 }
  0xda   :  { %v598_v27 = vpop.f32.mrf.mxu0  ;;  %v614_v28 = vpop.f32.mrf.mxu1 }
  0xdb   :  { %393 = vst [vmem:[#allocation2 + $0x31] sm:$0xff] %v614_v28  ;;  %v409_v49 = vmax.f32 %v598_v27, %v614_v28 }
  0xdc   :  { %v250_v29 = vpop.f32.mrf.mxu0  ;;  %v314_v30 = vpop.f32.mrf.mxu1 }
  0xdd   :  { %391 = vst [vmem:[#allocation2 + $0x11] sm:$0xff] %v314_v30  ;;  %v407_v42 = vmax.f32 %v250_v29, %v314_v30 }
  0xde   :  { %v601_v31 = vpop.f32.mrf.mxu0  ;;  %v617_v32 = vpop.f32.mrf.mxu1  ;;  %v424_v38 = vld [vmem:[#allocation2 + $0x20] sm:$0xff] }
  0xdf   :  { %396 = vst [vmem:[#allocation2 + $0x61] sm:$0xff] %v617_v32  ;;  %v440_v47 = vmax.f32 %v408_v41, %v424_v38  ;;  %v412_v1 = vmax.f32 %v601_v31, %v617_v32 }
  0xe0   :  { %v422_v34 = vld [vmem:[#allocation2] sm:$0xff]  ;;  %v263_v35 = vpop.f32.mrf.mxu0  ;;  %v327_v36 = vpop.f32.mrf.mxu1 }
  0xe1   :  { %v438_v37 = vmax.f32 %v406_v33, %v422_v34  ;;  %394 = vst [vmem:[#allocation2 + $0x41] sm:$0xff] %v327_v36  ;;  %v410_v56 = vmax.f32 %v263_v35, %v327_v36 }
  0xe2   :  { %v602_v39 = vpop.f32.mrf.mxu0  ;;  %v618_v40 = vpop.f32.mrf.mxu1  ;;  %v425_v43 = vld [vmem:[#allocation2 + $0x30] sm:$0xff] }
  0xe3   :  { %397 = vst [vmem:[#allocation2 + $0x71] sm:$0xff] %v618_v40  ;;  %v499_v48 = vmax.f32 %v438_v37, -1e+30  ;;  %v441_v53 = vmax.f32 %v409_v49, %v425_v43  ;;  %v413_v9 = vmax.f32 %v602_v39, %v618_v40 }
  0xe4   :  { %v423_v44 = vld [vmem:[#allocation2 + $0x10] sm:$0xff]  ;;  %v266_v45 = vpop.f32.mrf.mxu0  ;;  %v330_v46 = vpop.f32.mrf.mxu1 }
  0xe5   :  { %v439_v50 = vmax.f32 %v407_v42, %v423_v44  ;;  %395 = vst [vmem:[#allocation2 + $0x51] sm:$0xff] %v330_v46  ;;  %v411_v2 = vmax.f32 %v266_v45, %v330_v46 }
  0xe6   :  { %v605_v51 = vpop.f32.mrf.mxu0  ;;  %v621_v52 = vpop.f32.mrf.mxu1  ;;  %v428_v62 = vld [vmem:[#allocation2 + $0x60] sm:$0xff] }
  0xe7   :  { %v500_v54 = vmax.f32 %v439_v50, %v440_v47  ;;  %v507_v55 = vmax.f32 %v499_v48, %v439_v50  ;;  %400 = vst [vmem:[#allocation2 + $0xa1] sm:$0xff] %v621_v52  ;;  %v444_v7 = vmax.f32 %v412_v1, %v428_v62  ;;  %v416_v24 = vmax.f32 %v605_v51, %v621_v52 }
  0xe8   :  { %v426_v57 = vld [vmem:[#allocation2 + $0x40] sm:$0xff]  ;;  %v279_v58 = vpop.f32.mrf.mxu0  ;;  %v343_v59 = vpop.f32.mrf.mxu1 }
  0xe9   :  { %v508_v60 = vmax.f32 %v500_v54, %v441_v53  ;;  %515 = vst [vmem:[%s782_s2] sm:$0xff] %v507_v55  ;;  %v442_v61 = vmax.f32 %v410_v56, %v426_v57  ;;  %398 = vst [vmem:[#allocation2 + $0x81] sm:$0xff] %v343_v59  ;;  %v414_v16 = vmax.f32 %v279_v58, %v343_v59 }
  0xea   :  { %v606_v63 = vpop.f32.mrf.mxu0  ;;  %v622_v0 = vpop.f32.mrf.mxu1  ;;  %v429_v3 = vld [vmem:[#allocation2 + $0x70] sm:$0xff] }
  0xeb   :  { %516 = vst [vmem:[%s782_s2 + $0x8] sm:$0xff] %v508_v60  ;;  %401 = vst [vmem:[#allocation2 + $0xb1] sm:$0xff] %v622_v0  ;;  %v501_v8 = vmax.f32 %v441_v53, %v442_v61  ;;  %v445_v13 = vmax.f32 %v413_v9, %v429_v3  ;;  %v417_v32 = vmax.f32 %v606_v63, %v622_v0 }
  0xec   :  { %v427_v4 = vld [vmem:[#allocation2 + $0x50] sm:$0xff]  ;;  %v282_v5 = vpop.f32.mrf.mxu0  ;;  %v346_v6 = vpop.f32.mrf.mxu1 }
  0xed   :  { %v443_v10 = vmax.f32 %v411_v2, %v427_v4  ;;  %399 = vst [vmem:[#allocation2 + $0x91] sm:$0xff] %v346_v6  ;;  %v415_v25 = vmax.f32 %v282_v5, %v346_v6 }
  0xee   :  { %v609_v11 = vpop.f32.mrf.mxu0  ;;  %v625_v12 = vpop.f32.mrf.mxu1  ;;  %v432_v22 = vld [vmem:[#allocation2 + $0xa0] sm:$0xff] }
  0xef   :  { %v502_v14 = vmax.f32 %v443_v10, %v444_v7  ;;  %v509_v15 = vmax.f32 %v501_v8, %v443_v10  ;;  %404 = vst [vmem:[#allocation2 + $0xe1] sm:$0xff] %v625_v12  ;;  %v448_v30 = vmax.f32 %v416_v24, %v432_v22  ;;  %v420_v43 = vmax.f32 %v609_v11, %v625_v12 }
  0xf0   :  { %v430_v17 = vld [vmem:[#allocation2 + $0x80] sm:$0xff]  ;;  %v295_v18 = vpop.f32.mrf.mxu0  ;;  %v359_v19 = vpop.f32.mrf.mxu1 }
  0xf1   :  { %v510_v20 = vmax.f32 %v502_v14, %v445_v13  ;;  %517 = vst [vmem:[%s782_s2 + $0x10] sm:$0xff] %v509_v15  ;;  %v446_v21 = vmax.f32 %v414_v16, %v430_v17  ;;  %402 = vst [vmem:[#allocation2 + $0xc1] sm:$0xff] %v359_v19  ;;  %v418_v37 = vmax.f32 %v295_v18, %v359_v19 }
  0xf2   :  { %v626_v23 = vpop.f32.mrf.mxu1  ;;  %v433_v26 = vld [vmem:[#allocation2 + $0xb0] sm:$0xff]  ;;  %v610_v28 = vpop.f32.mrf.mxu0 }
  0xf3   :  { %518 = vst [vmem:[%s782_s2 + $0x18] sm:$0xff] %v510_v20  ;;  %405 = vst [vmem:[#allocation2 + $0xf1] sm:$0xff] %v626_v23  ;;  %v503_v31 = vmax.f32 %v445_v13, %v446_v21  ;;  %v449_v34 = vmax.f32 %v417_v32, %v433_v26  ;;  %v421_v49 = vmax.f32 %v610_v28, %v626_v23 }
  0xf4   :  { %v431_v27 = vld [vmem:[#allocation2 + $0x90] sm:$0xff]  ;;  %v362_v29 = vpop.f32.mrf.mxu1  ;;  %v298_v39 = vpop.f32.mrf.mxu0 }
  0xf5   :  { %v447_v33 = vmax.f32 %v415_v25, %v431_v27  ;;  %403 = vst [vmem:[#allocation2 + $0xd1] sm:$0xff] %v362_v29  ;;  %v419_v44 = vmax.f32 %v298_v39, %v362_v29 }
  0xf6   :  { %v436_v42 = vld [vmem:[#allocation2 + $0xe0] sm:$0xff] }
  0xf7   :  { %v504_v35 = vmax.f32 %v447_v33, %v448_v30  ;;  %v511_v36 = vmax.f32 %v503_v31, %v447_v33  ;;  %v452_v47 = vmax.f32 %v420_v43, %v436_v42 }
  0xf8   :  { %v434_v38 = vld [vmem:[#allocation2 + $0xc0] sm:$0xff] }
  0xf9   :  { %v512_v40 = vmax.f32 %v504_v35, %v449_v34  ;;  %519 = vst [vmem:[%s782_s2 + $0x20] sm:$0xff] %v511_v36  ;;  %v450_v41 = vmax.f32 %v418_v37, %v434_v38 }
  0xfa   :  { %v437_v45 = vld [vmem:[#allocation2 + $0xf0] sm:$0xff] }
  0xfb   :  { %520 = vst [vmem:[%s782_s2 + $0x28] sm:$0xff] %v512_v40  ;;  %v505_v48 = vmax.f32 %v449_v34, %v450_v41  ;;  %v453_v51 = vmax.f32 %v421_v49, %v437_v45 }
  0xfc   :  { %v435_v46 = vld [vmem:[#allocation2 + $0xd0] sm:$0xff] }
  0xfd   :  { %v451_v50 = vmax.f32 %v419_v44, %v435_v46 }
  0xff   :  { %v506_v52 = vmax.f32 %v451_v50, %v452_v47  ;;  %v513_v53 = vmax.f32 %v505_v48, %v451_v50 }
 0x101   :  { %v514_v54 = vmax.f32 %v506_v52, %v453_v51  ;;  %521 = vst [vmem:[%s782_s2 + $0x30] sm:$0xff] %v513_v53 }
 0x103   :  { %522 = vst [vmem:[%s782_s2 + $0x38] sm:$0xff] %v514_v54 }

</bundles_post_ra>
